<compile_context>
chip_gen: v6e
topology: v6e:2x2x1
jax: 0.10.0
libtpu: 0.0.40
codegen_flags: <defaults>
</compile_context>

<pallas_src>
import functools

import jax
import jax.numpy as jnp
from jax.experimental import pallas as pl
from jax.experimental.pallas import tpu as pltpu


# --------------------------------------------------------------------------- #
# Counter-based uniform RNG for a (T, D) block.  int32-only ops (xor, masked
# shifts, wrapping multiplies, compare) -> portable to Mosaic and interpret.
# --------------------------------------------------------------------------- #
def _uniform01_block(seed, block_idx, t, d):
    rows = jax.lax.broadcasted_iota(jnp.int32, (t, d), 0)
    cols = jax.lax.broadcasted_iota(jnp.int32, (t, d), 1)
    # Unique per-output-element counter (wraps mod 2^32 for huge outputs).
    x = (block_idx * t + rows) * d + cols
    x = x ^ (seed * jnp.int32(0x61C88647))
    # splitmix-style mixing; "(x >> s) & mask" emulates a logical shift on
    # int32 so the math is bit-identical to the uint32 hash.
    x = (x ^ ((x >> 16) & 0xFFFF)) * jnp.int32(0x7FEB352D)
    x = (x ^ ((x >> 15) & 0x1FFFF)) * jnp.int32(0x68E31DA5)
    x = x ^ ((x >> 16) & 0xFFFF)
    # Low 23 bits -> exact float32 uniform in [0, 1).
    return (x & jnp.int32(0x7FFFFF)).astype(jnp.float32) * jnp.float32(
        1.0 / (1 << 23))


# ------------------------------- kernels ----------------------------------- #
def _embed_kernel(ids_ref, tab_ref, out_ref):
    # ids_ref: (T, 1) int32   tab_ref: (V, D) resident   out_ref: (T, D)
    t, _ = out_ref.shape
    v = tab_ref.shape[0]
    ids = ids_ref[...]                                          # (T, 1)
    one_hot = (jax.lax.broadcasted_iota(jnp.int32, (t, v), 1) == ids
               ).astype(tab_ref.dtype)                          # (T, V)
    out_ref[...] = jnp.dot(one_hot, tab_ref[...],
                           preferred_element_type=jnp.float32
                           ).astype(out_ref.dtype)


def _embed_dropout_kernel(seed_ref, ids_ref, tab_ref, out_ref, *, rate):
    # Gather T rows via one-hot MXU matmul, then apply blocked dropout.
    t, d = out_ref.shape
    v = tab_ref.shape[0]
    ids = ids_ref[...]
    one_hot = (jax.lax.broadcasted_iota(jnp.int32, (t, v), 1) == ids
               ).astype(tab_ref.dtype)
    emb = jnp.dot(one_hot, tab_ref[...], preferred_element_type=jnp.float32)

    u = _uniform01_block(seed_ref[0], pl.program_id(0), t, d)   # (T, D)
    keep = u >= jnp.float32(rate)                               # P = 1 - rate
    scale = jnp.float32(1.0 / (1.0 - rate))
    out_ref[...] = jnp.where(keep, emb * scale,
                             jnp.float32(0.0)).astype(out_ref.dtype)


# ------------------------------- wrapper ----------------------------------- #
def word_embedding_forward(ids, table, *, dropout_rate=0.0, training=False,
                           seed=0, block_tokens=256):
    """Pallas equivalent of WordEmbedding.forward (embedding + dropout)."""
    B, S = ids.shape
    V, D = table.shape
    N = B * S

    rate = float(dropout_rate)
    use_dropout = training and rate > 0.0
    if use_dropout and rate >= 1.0:
        # torch.nn.Dropout(p=1.0) zeroes everything (avoid 1/(1-p) div-by-0).
        return jnp.zeros((B, S, D), dtype=table.dtype)

    # Token block size: 256, or N rounded up to a multiple of 8 for tiny N.
    T = int(block_tokens)
    if N < T:
        T = max(8, ((N + 7) // 8) * 8)
    N_pad = ((N + T - 1) // T) * T
    grid = (N_pad // T,)

    flat_ids = ids.reshape(-1).astype(jnp.int32)
    if N_pad != N:
        flat_ids = jnp.pad(flat_ids, (0, N_pad - N))   # padded rows sliced off
    ids2d = flat_ids.reshape(N_pad, 1)

    # VMEM budget: resident table + double-buffered (T, D) out and (T, 1) ids.
    table_bytes = V * D * jnp.dtype(table.dtype).itemsize
    vmem_bytes = int(max(32 * 1024 * 1024,
                         table_bytes + 4 * T * (D + 1) * 4 + (4 << 20)))
    cparams = pltpu.CompilerParams(
        dimension_semantics=("parallel",),      # independent token blocks
        vmem_limit_bytes=vmem_bytes,
    )

    ids_spec = pl.BlockSpec((T, 1), lambda i: (i, 0))
    tab_spec = pl.BlockSpec((V, D), lambda i: (0, 0))   # table resident in VMEM
    out_spec = pl.BlockSpec((T, D), lambda i: (i, 0))
    out_shape = jax.ShapeDtypeStruct((N_pad, D), table.dtype)

    if not use_dropout:
        out = pl.pallas_call(
            _embed_kernel,
            out_shape=out_shape,
            grid=grid,
            in_specs=[ids_spec, tab_spec],
            out_specs=out_spec,
            compiler_params=cparams,
        )(ids2d, table)
    else:
        seed_arr = jnp.asarray([seed], dtype=jnp.int32)
        kernel = functools.partial(_embed_dropout_kernel, rate=rate)
        out = pl.pallas_call(
            kernel,
            out_shape=out_shape,
            grid=grid,
            in_specs=[pl.BlockSpec(memory_space=pltpu.MemorySpace.SMEM),
                      ids_spec, tab_spec],
            out_specs=out_spec,
            compiler_params=cparams,
        )(seed_arr, ids2d, table)

    return out[:N].reshape(B, S, D)


# --------------------------------- main ------------------------------------ #
if __name__ == "__main__":
    # Module hyper-params (small, synthetic).
    n_token = 50
    emb_dim = 128
    dropout = 0.5
    B, S = 2, 8

    key = jax.random.PRNGKey(0)
    k_tab, k_ids = jax.random.split(key)

    # nn.Embedding(n_token + 1, emb_dim, padding_idx=n_token): padding row = 0.
    table = jax.random.normal(k_tab, (n_token + 1, emb_dim), dtype=jnp.float32)
    table = table.at[n_token].set(0.0)

    # Token ids in [0, n_token]; force one padding index to exercise it.
    ids = jax.random.randint(k_ids, (B, S), 0, n_token + 1, dtype=jnp.int32)
    ids = ids.at[0, 0].set(n_token)

    ref = jnp.take(table, ids, axis=0)

    # Eval-mode forward (dropout == identity); check against pure-JAX ref.
    out = word_embedding_forward(ids, table, dropout_rate=dropout,
                                 training=False)
    out = jax.block_until_ready(out)
    assert out.shape == (B, S, emb_dim)
    assert jnp.allclose(out, ref, atol=1e-5, rtol=1e-5), "embedding mismatch"
    assert jnp.all(out[0, 0] == 0.0), "padding row not zero"

    # Training-mode forward (blocked in-kernel dropout).
    out_tr = word_embedding_forward(ids, table, dropout_rate=dropout,
                                    training=True, seed=123)
    out_tr = jax.block_until_ready(out_tr)
    assert out_tr.shape == (B, S, emb_dim)
    scale = 1.0 / (1.0 - dropout)
    ok = (out_tr == 0.0) | jnp.isclose(out_tr, ref * scale,
                                       atol=1e-5, rtol=1e-5)
    assert bool(jnp.all(ok)), "dropout output must be 0 or scaled embedding"
    nz = ref != 0.0
    keep_frac = float(jnp.sum((out_tr != 0.0) & nz) /
                      jnp.maximum(jnp.sum(nz), 1))
    assert 0.3 < keep_frac < 0.7, "dropout keep fraction off"

    print("KERNEL_OK")
</pallas_src>

<mosaic_0001>
module attributes {stable_mosaic.version = 11 : i64} {
  func.func @_embed_kernel(%arg0: i32, %arg1: memref<16x1xi32, #tpu.memory_space<vmem>>, %arg2: memref<51x128xf32, #tpu.memory_space<vmem>>, %arg3: memref<16x128xf32, #tpu.memory_space<vmem>>) attributes {dimension_semantics = [#tpu.dimension_semantics<parallel>], iteration_bounds = array<i64: 1>, scalar_prefetch = 0 : i64, scratch_operands = 0 : i64, tpu.core_type = #tpu.core_type<tc>, window_params = [{transform_indices = @transform_0, window_bounds = array<i64: 16, 1>}, {pipeline_mode = #tpu.pipeline_mode<synchronous>, transform_indices = @transform_1, window_bounds = array<i64: 51, 128>}, {transform_indices = @transform_2, window_bounds = array<i64: 16, 128>}]} {
    %c0 = arith.constant 0 : index
    %c0_0 = arith.constant 0 : index
    %0 = vector.load %arg1[%c0, %c0_0] : memref<16x1xi32, #tpu.memory_space<vmem>>, vector<16x1xi32>
    %1 = tpu.iota {dimensions = array<i32: 1>} : vector<16x51xi32>
    %2 = vector.broadcast %0 : vector<16x1xi32> to vector<16x51xi32>
    %3 = arith.cmpi eq, %1, %2 : vector<16x51xi32>
    %4 = arith.extui %3 : vector<16x51xi1> to vector<16x51xi32>
    %5 = arith.sitofp %4 : vector<16x51xi32> to vector<16x51xf32>
    %c0_1 = arith.constant 0 : index
    %c0_2 = arith.constant 0 : index
    %6 = vector.load %arg2[%c0_1, %c0_2] : memref<51x128xf32, #tpu.memory_space<vmem>>, vector<51x128xf32>
    %cst = arith.constant dense<0.000000e+00> : vector<16x128xf32>
    %7 = tpu.matmul %5, %6, %cst {dimension_numbers = #tpu.dot_dimension_numbers<[1], [0], [0], [1], [0, 0, 1, 1], [], []>} : vector<16x51xf32>, vector<51x128xf32>, vector<16x128xf32> -> vector<16x128xf32>
    %c0_3 = arith.constant 0 : index
    %c0_4 = arith.constant 0 : index
    %8 = vector.load %arg3[%c0_3, %c0_4] : memref<16x128xf32, #tpu.memory_space<vmem>>, vector<16x128xf32>
    tpu.vector_store %arg3[%c0_3, %c0_4], %7 {strides = array<i32>} : memref<16x128xf32, #tpu.memory_space<vmem>>, vector<16x128xf32>,
    return
  }
  func.func @transform_0(%arg0: i32) -> (i32, i32) {
    %c0_i32 = arith.constant 0 : i32
    %c0_i32_0 = arith.constant 0 : i32
    return %arg0, %c0_i32 : i32, i32
  }
  func.func @transform_1(%arg0: i32) -> (i32, i32) {
    %c0_i32 = arith.constant 0 : i32
    %c0_i32_0 = arith.constant 0 : i32
    %c0_i32_1 = arith.constant 0 : i32
    return %c0_i32, %c0_i32_0 : i32, i32
  }
  func.func @transform_2(%arg0: i32) -> (i32, i32) {
    %c0_i32 = arith.constant 0 : i32
    %c0_i32_0 = arith.constant 0 : i32
    return %arg0, %c0_i32 : i32, i32
  }
}

</mosaic_0001>

<bundles_post_ra>
// kernel: tpu_custom_call.1
= control target key start
LH: loop header
LB: loop body
LE: loop exit
PB: predicated region body
PF: predicated region fallthrough
CT: control target
= control target key end

     0   :  { %7 = vsyncpa [#allocation3], 0  ;;  %s275_s0 = inlined_call_operand.vmem [shape: s32[16,1], index: 0, kind: input, shape index: {}]   ;;  %s276_s1 = inlined_call_operand.hbm [shape: f32[51,128], index: 1, kind: input, shape index: {}]   ;;  %s277_s2 = inlined_call_operand.hbm [shape: f32[16,128], index: 2, kind: output, shape index: {}]  }
   0x1   :  { %8 = vsyncpa [#allocation4], 0  ;;  %s236_s9 = smov [#allocation2]  }
   0x2   :  { %s16_s10 = sshll.u32 %s236_s9, 4  ;;  %s17_s10 = int_to_ptr.vmem [resolvable:$true] %s16_s10 }
   0x3   :  { %s200_s11 = scalar_lea.vmem %s17_s10, 896  ;;  %p205_p1 = scmp.lt.s32.totalorder %s17_s10, %s17_s10 }
   0x4   :  { %p201_p0 = scmp.ne.s32.totalorder %s17_s10, %s200_s11  ;;  %p206_p2 = scmp.lt.s32.totalorder %s200_s11, %s200_s11 }
   0x6   :  { %p207_p3 = por %p206_p2, %p205_p1 }
   0x8   :  { %p208_p4 = pnand %p207_p3, %p201_p0 }
   0xa   :  { %211 = shalt.err (!%p208_p4)
}
   0xb   :  { %s237_s12 = smov 128   ;;  %s238_s13 = smov 8  }
   0xc   :  { %22 = dma.hbm_to_vmem [thread:$0]  %s276_s1, 896, %s17_s10, [#allocation3], %s237_s12, %s237_s12, %s238_s13  }
   0xd   :  { %232 = dma.done.wait [#allocation3], 896  }
   0xe   :  { %233 = vsyncadd [#allocation3], 4294966400  ;;  %v239_v0 = vmov 0   ;;  %vm56_vm0 = vcmask 1042432   ;;  %v26_v1 = vld [vmem:[%s275_s0] sm:$0xff]  ;;  %v47_v3 = vld [vmem:[#allocation2 + $0x28] sm:$0xff]  ;;  %v28_v10 = vlaneseq }
   0xf   :  { %191 = vset.pattern.permute.xlu0 %v239_v0  ;;  %v48_v2 = vld [vmem:[#allocation2 + $0x30] sm:$0x7]  ;;  %v27_v4 = vld [vmem:[%s275_s0 + $0x8] sm:$0xff]  ;;  %v46_v5 = vld [vmem:[#allocation2 + $0x20] sm:$0xff]  ;;  %vm49_vm1 = vcmask 416768   ;;  %v240_v13 = vmov 0.0  }
  0x10   :  { %31 = vperm.xlu0 %191, %v26_v1   ;;  %168 = vmatprep.subr.msk.mxu0 %vm56_vm0, %v48_v2  ;;  %v45_v6 = vld [vmem:[#allocation2 + $0x18] sm:$0xff]  ;;  %v44_v7 = vld [vmem:[#allocation2 + $0x10] sm:$0xff]  ;;  %v43_v8 = vld [vmem:[#allocation2 + $0x8] sm:$0xff]  ;;  %v29_v11 = vand.u32 127, %v28_v10  ;;  %s241_s0 = smov [#allocation5]  }
  0x11   :  { %169 = vmatpush3.msk.msra.mxu0 %vm56_vm0, %v48_v2  ;;  %v42_v9 = vld [vmem:[#allocation2] sm:$0xff]  ;;  %s142_s1 = sshll.u32 %s241_s0, 4  ;;  %s143_s1 = int_to_ptr.vmem [resolvable:$true] %s142_s1 }
  0x12   :  { %170 = vmatprep.subr.mxu0 %v47_v3  ;;  %s212_s20 = scalar_lea.vmem %s143_s1, 256  ;;  %p217_p6 = scmp.lt.s32.totalorder %s143_s1, %s143_s1 }
  0x13   :  { %171 = vmatpush3.msra.mxu0 %v47_v3  ;;  %p213_p5 = scmp.ne.s32.totalorder %s143_s1, %s212_s20  ;;  %p218_p7 = scmp.lt.s32.totalorder %s212_s20, %s212_s20 }
  0x14   :  { %34 = vperm.xlu0 %191, %v27_v4   ;;  %172 = vmatprep.subr.mxu0 %v46_v5 }
  0x15   :  { %173 = vmatpush3.msra.mxu0 %v46_v5  ;;  %p219_p8 = por %p218_p7, %p217_p6 }
  0x16   :  { %174 = vmatprep.subr.mxu0 %v45_v6 }
  0x17   :  { %175 = vmatpush3.msra.mxu0 %v45_v6  ;;  %p220_p9 = pnand %p219_p8, %p213_p5 }
  0x18   :  { %176 = vmatprep.subr.mxu0 %v44_v7 }
  0x19   :  { %177 = vmatpush3.msra.mxu0 %v44_v7 }
  0x1a   :  { %178 = vmatprep.subr.mxu0 %v43_v8 }
  0x1b   :  { %179 = vmatpush3.msra.mxu0 %v43_v8 }
  0x1c   :  { %180 = vmatprep.subr.mxu0 %v42_v9 }
  0x1d   :  { %181 = vmatpush3.msra.mxu0 %v42_v9 }
  0x8b   :  { %v32_v12 = vpop.permute.xlu0 %31 }
  0x8c   :  { %vm36_vm2 = vcmp.eq.s32.totalorder %v29_v11, %v32_v12 }
  0x8d   :  { %v154_v14 = vsel %vm36_vm2, 1.0, %v240_v13 }
  0x8e   :  { %182 = vmatprep.mubr.msk.f32.mxu0 %vm49_vm1, %v154_v14 }
  0x8f   :  { %v35_v15 = vpop.permute.xlu0 %34 }
  0x90   :  { %vm37_vm3 = vcmp.eq.s32.totalorder %v29_v11, %v35_v15 }
  0x91   :  { %v155_v16 = vsel %vm37_vm3, 1.0, %v240_v13 }
  0x92   :  { %183 = vmatmul.mubr.msk.f32.vlgmr.msra.gmra.mxu0 %vm49_vm1, %v155_v16 }
 0x152   :  { %v184_v17 = vpop.f32.mrf.mxu0 }
 0x153   :  { %136 = vst [vmem:[#allocation5 + $0x8] sm:$0xff] %v184_v17 }
 0x154   :  { %v126_v18 = vpop.f32.mrf.mxu0 }
 0x155   :  { %135 = vst [vmem:[#allocation5] sm:$0xff] %v126_v18 }
 0x156   :  { %223 = shalt.err (!%p220_p9)
}
 0x157   :  { %148 = dma.vmem_to_hbm [thread:$0]  %s143_s1, 256, %s277_s2, [#allocation4], %s237_s12, %s237_s12, %s238_s13  }
 0x158   :  { %234 = dma.done.wait [#allocation4], 256  }
 0x159   :  { %235 = vsyncadd [#allocation4], 4294967040 }
 0x15a   :  { %152 = vsyncpa [#allocation3], 1 }
 0x15b   :  { %153 = vsyncpa [#allocation4], 1 }

</bundles_post_ra>
